<compile_context>
chip_gen: v7x
topology: tpu7x:2x2x1
jax: 0.10.0
libtpu: 0.0.40
codegen_flags: <defaults>
</compile_context>

<pallas_src>
import functools

import jax
import jax.numpy as jnp
from jax import lax
from jax.experimental import pallas as pl
from jax.experimental.pallas import tpu as pltpu


def _round_up(v, m):
    return ((v + m - 1) // m) * m


def _mv_lstm_kernel(xg_ref, whh_ref, hs_ref, *, T, TB, TL, Hp):
    """Serial LSTM recurrence over one batch tile.

    xg_ref : (T, TB, 4*Hp)  precomputed x@Wih + b, time-major; g columns pre-scaled by 2
    whh_ref: (Hp, 4*Hp)     gate-fused recurrent weights (i|f|g|o), zero-padded,
                            g columns pre-scaled by 2 (tanh-via-sigmoid trick)
    hs_ref : (TB, TL*Hp)    lane-dense slab of the hidden states of the last TL steps
    """
    f32 = jnp.float32
    whh = whh_ref[...]                       # keep recurrent weights resident

    h = jnp.zeros((TB, Hp), f32)
    c = jnp.zeros((TB, Hp), f32)

    # Fully unrolled serial recurrence (T is a small static constant).
    # One fused (TB, Hp)@(Hp, 4*Hp) MXU op + ONE sigmoid EUP pass per step.
    for t in range(T):
        pre = xg_ref[t] + jnp.dot(h, whh, preferred_element_type=f32)   # (TB, 4*Hp)
        sig = jax.nn.sigmoid(pre)            # single full-vreg EUP pass
        # 32-lane gate slices of the 128-lane vreg; verify in the bundle that the
        # lane extracts land on the XLU slot (feedback item), they are filler here.
        i_g = sig[:, 0 * Hp:1 * Hp]
        f_g = sig[:, 1 * Hp:2 * Hp]
        g_g = 2.0 * sig[:, 2 * Hp:3 * Hp] - 1.0       # tanh(x) = 2*sigmoid(2x) - 1
        o_g = sig[:, 3 * Hp:4 * Hp]
        c = f_g * c + i_g * g_g
        h = o_g * jnp.tanh(c)
        if t >= T - TL:                      # stash only the tail the module returns
            j = t - (T - TL)
            hs_ref[:, j * Hp:(j + 1) * Hp] = h


_GATE_SCALE = (1.0, 1.0, 2.0, 1.0)           # i, f, g, o  (g scaled for tanh trick)


def _pack_params(params, Hp):
    """(4,F,H)/(4,H,H)/(4,1,H) -> fused, zero-padded, g-scaled layout."""
    wih, whh, b, _, _ = params
    F, H = wih.shape[1], wih.shape[2]
    wih_p = jnp.zeros((F, 4 * Hp), jnp.float32)
    whh_p = jnp.zeros((Hp, 4 * Hp), jnp.float32)
    b_p = jnp.zeros((1, 4 * Hp), jnp.float32)
    for k in range(4):                       # torch.nn.LSTM gate order i, f, g, o
        s = _GATE_SCALE[k]
        wih_p = wih_p.at[:, k * Hp:k * Hp + H].set(s * wih[k])
        whh_p = whh_p.at[:H, k * Hp:k * Hp + H].set(s * whh[k])
        b_p = b_p.at[:, k * Hp:k * Hp + H].set(s * b[k].reshape(1, H))
    return wih_p, whh_p, b_p


@functools.partial(jax.jit, static_argnums=(2,))
def mv_lstm_forward(x, params, target_length):
    """x: (B, T, F) float32 -> (B, target_length, 1) float32 (zero initial state)."""
    B, T, F = x.shape
    H = params[1].shape[-1]                         # whh: (4, H, H)
    TL = int(target_length)
    assert TL <= T, "target_length must not exceed seq_length"

    Hp = max(32, _round_up(H, 32))                  # per-gate lane pad (fused = 4*Hp)
    TB = 128 if B > 128 else max(8, _round_up(B, 8))  # batch tile = MXU M dimension
    Bp = _round_up(max(B, TB), TB)
    grid = Bp // TB

    wih_p, whh_p, b_p = _pack_params(params, Hp)
    wlin, blin = params[3], params[4]

    # Input projection hoisted to XLA (fully parallel, off the serial chain);
    # fused with the pad/transpose under this jit, so no extra dispatches.
    # NOTE: b here is the combined torch bias b_ih + b_hh.
    x_pad = jnp.pad(x.astype(jnp.float32), ((0, Bp - B), (0, 0), (0, 0)))
    xg = jnp.einsum("btf,fg->tbg", x_pad, wih_p,
                    preferred_element_type=jnp.float32) + b_p        # (T, Bp, 4*Hp)

    kernel = functools.partial(_mv_lstm_kernel, T=T, TB=TB, TL=TL, Hp=Hp)

    # VMEM budget per grid step (TB=128): xg block 512 KiB (x2 buffers) + whh 16 KiB
    # + out 64 KiB (x2) -- far under the 32 MiB limit set below (safe on v7x too).
    hs = pl.pallas_call(
        kernel,
        out_shape=jax.ShapeDtypeStruct((Bp, TL * Hp), jnp.float32),
        grid=(grid,),
        in_specs=[
            pl.BlockSpec((T, TB, 4 * Hp), lambda i: (0, i, 0)),      # batch-tiled xg
            pl.BlockSpec((Hp, 4 * Hp), lambda i: (0, 0)),            # resident weights
        ],
        out_specs=pl.BlockSpec((TB, TL * Hp), lambda i: (i, 0)),     # lane-dense slab
        compiler_params=pltpu.CompilerParams(
            dimension_semantics=("parallel",),          # split batch tiles across TCs
            vmem_limit_bytes=32 * 1024 * 1024,
        ),
    )(xg, whh_p)

    hs = hs.reshape(Bp, TL, Hp)[:B, :, :H]              # drop batch / lane padding
    return hs @ wlin + blin                             # Linear(H, 1): (B, TL, 1)


def make_params(key, n_features, n_hidden):
    """Deterministic synthetic parameters, matching torch.nn.LSTM/Linear shapes.

    b is the combined bias b_ih + b_hh (sum the two torch vectors when porting
    real weights)."""
    k = 1.0 / jnp.sqrt(jnp.float32(n_hidden))
    ks = jax.random.split(key, 5)
    wih = jax.random.uniform(ks[0], (4, n_features, n_hidden), jnp.float32, -k, k)
    whh = jax.random.uniform(ks[1], (4, n_hidden, n_hidden), jnp.float32, -k, k)
    b = jax.random.uniform(ks[2], (4, 1, n_hidden), jnp.float32, -k, k)
    wlin = jax.random.uniform(ks[3], (n_hidden, 1), jnp.float32, -k, k)
    blin = jax.random.uniform(ks[4], (1, 1), jnp.float32, -k, k)
    return wih, whh, b, wlin, blin


def reference_forward(x, params, target_length):
    """Pure-JAX reference (same math as torch: i,f,g,o gates, zero init state)."""
    wih, whh, b, wlin, blin = params
    B, T, F = x.shape
    H = whh.shape[-1]

    def step(carry, x_t):
        h, c = carry
        i_g = jax.nn.sigmoid(x_t @ wih[0] + h @ whh[0] + b[0])
        f_g = jax.nn.sigmoid(x_t @ wih[1] + h @ whh[1] + b[1])
        g_g = jnp.tanh(x_t @ wih[2] + h @ whh[2] + b[2])
        o_g = jax.nn.sigmoid(x_t @ wih[3] + h @ whh[3] + b[3])
        c = f_g * c + i_g * g_g
        h = o_g * jnp.tanh(c)
        return (h, c), h

    x_tm = jnp.transpose(x, (1, 0, 2))
    (_, _), hs = lax.scan(step,
                          (jnp.zeros((B, H), jnp.float32),
                           jnp.zeros((B, H), jnp.float32)),
                          x_tm)
    hs = jnp.transpose(hs, (1, 0, 2))          # (B, T, H)
    out = hs @ wlin + blin                     # (B, T, 1)
    return out[:, -target_length:, :]


if __name__ == "__main__":
    # Small shapes consistent with the module's forward:
    batch, seq_len, n_features = 2, 8, 4
    n_hidden, target_length = 20, 4

    key = jax.random.PRNGKey(0)
    kx, kp = jax.random.split(key)
    x = jax.random.normal(kx, (batch, seq_len, n_features), jnp.float32)
    params = make_params(kp, n_features, n_hidden)

    out = jax.block_until_ready(mv_lstm_forward(x, params, target_length))
    assert out.shape == (batch, target_length, 1), out.shape

    ref = jax.block_until_ready(reference_forward(x, params, target_length))
    max_err = jnp.max(jnp.abs(out - ref))
    assert jnp.allclose(out, ref, rtol=2e-2, atol=2e-2), f"max abs err: {max_err}"

    print("KERNEL_OK")
</pallas_src>

<mosaic_0001>
module attributes {stable_mosaic.version = 11 : i64} {
  func.func @_mv_lstm_kernel(%arg0: i32, %arg1: memref<8x8x128xf32, #tpu.memory_space<vmem>>, %arg2: memref<32x128xf32, #tpu.memory_space<vmem>>, %arg3: memref<8x128xf32, #tpu.memory_space<vmem>>) attributes {dimension_semantics = [#tpu.dimension_semantics<parallel>], iteration_bounds = array<i64: 1>, scalar_prefetch = 0 : i64, scratch_operands = 0 : i64, tpu.core_type = #tpu.core_type<tc>, window_params = [{transform_indices = @transform_0, window_bounds = array<i64: 8, 8, 128>}, {pipeline_mode = #tpu.pipeline_mode<synchronous>, transform_indices = @transform_1, window_bounds = array<i64: 32, 128>}, {transform_indices = @transform_2, window_bounds = array<i64: 8, 128>}]} {
    %c0 = arith.constant 0 : index
    %c0_0 = arith.constant 0 : index
    %0 = vector.load %arg2[%c0, %c0_0] : memref<32x128xf32, #tpu.memory_space<vmem>>, vector<32x128xf32>
    %cst = arith.constant 0.000000e+00 : f32
    %1 = vector.broadcast %cst : f32 to vector<8x32xf32>
    %cst_1 = arith.constant 0.000000e+00 : f32
    %2 = vector.broadcast %cst_1 : f32 to vector<8x32xf32>
    %c0_2 = arith.constant 0 : index
    %c0_3 = arith.constant 0 : index
    %c0_4 = arith.constant 0 : index
    %3 = vector.load %arg1[%c0_2, %c0_3, %c0_4] : memref<8x8x128xf32, #tpu.memory_space<vmem>>, vector<1x8x128xf32>
    %4 = vector.shape_cast %3 : vector<1x8x128xf32> to vector<8x128xf32>
    %cst_5 = arith.constant dense<0.000000e+00> : vector<8x128xf32>
    %5 = tpu.matmul %1, %0, %cst_5 {dimension_numbers = #tpu.dot_dimension_numbers<[1], [0], [0], [1], [0, 0, 1, 1], [], []>} : vector<8x32xf32>, vector<32x128xf32>, vector<8x128xf32> -> vector<8x128xf32>
    %6 = arith.addf %4, %5 : vector<8x128xf32>
    %7 = arith.negf %6 : vector<8x128xf32>
    %8 = math.exp %7 : vector<8x128xf32>
    %cst_6 = arith.constant 1.000000e+00 : f32
    %9 = vector.broadcast %cst_6 : f32 to vector<8x128xf32>
    %10 = arith.addf %9, %8 : vector<8x128xf32>
    %11 = arith.divf %9, %10 : vector<8x128xf32>
    %12 = vector.extract_strided_slice %11 {offsets = [0, 0], sizes = [8, 32], strides = [1, 1]} : vector<8x128xf32> to vector<8x32xf32>
    %13 = vector.extract_strided_slice %11 {offsets = [0, 32], sizes = [8, 32], strides = [1, 1]} : vector<8x128xf32> to vector<8x32xf32>
    %14 = vector.extract_strided_slice %11 {offsets = [0, 64], sizes = [8, 32], strides = [1, 1]} : vector<8x128xf32> to vector<8x32xf32>
    %cst_7 = arith.constant 2.000000e+00 : f32
    %15 = vector.broadcast %cst_7 : f32 to vector<8x32xf32>
    %16 = arith.mulf %15, %14 : vector<8x32xf32>
    %cst_8 = arith.constant 1.000000e+00 : f32
    %17 = vector.broadcast %cst_8 : f32 to vector<8x32xf32>
    %18 = arith.subf %16, %17 : vector<8x32xf32>
    %19 = vector.extract_strided_slice %11 {offsets = [0, 96], sizes = [8, 32], strides = [1, 1]} : vector<8x128xf32> to vector<8x32xf32>
    %20 = arith.mulf %13, %2 : vector<8x32xf32>
    %21 = arith.mulf %12, %18 : vector<8x32xf32>
    %22 = arith.addf %20, %21 : vector<8x32xf32>
    %23 = math.tanh %22 : vector<8x32xf32>
    %24 = arith.mulf %19, %23 : vector<8x32xf32>
    %c1 = arith.constant 1 : index
    %c0_9 = arith.constant 0 : index
    %c0_10 = arith.constant 0 : index
    %25 = vector.load %arg1[%c1, %c0_9, %c0_10] : memref<8x8x128xf32, #tpu.memory_space<vmem>>, vector<1x8x128xf32>
    %26 = vector.shape_cast %25 : vector<1x8x128xf32> to vector<8x128xf32>
    %cst_11 = arith.constant dense<0.000000e+00> : vector<8x128xf32>
    %27 = tpu.matmul %24, %0, %cst_11 {dimension_numbers = #tpu.dot_dimension_numbers<[1], [0], [0], [1], [0, 0, 1, 1], [], []>} : vector<8x32xf32>, vector<32x128xf32>, vector<8x128xf32> -> vector<8x128xf32>
    %28 = arith.addf %26, %27 : vector<8x128xf32>
    %29 = arith.negf %28 : vector<8x128xf32>
    %30 = math.exp %29 : vector<8x128xf32>
    %cst_12 = arith.constant 1.000000e+00 : f32
    %31 = vector.broadcast %cst_12 : f32 to vector<8x128xf32>
    %32 = arith.addf %31, %30 : vector<8x128xf32>
    %33 = arith.divf %31, %32 : vector<8x128xf32>
    %34 = vector.extract_strided_slice %33 {offsets = [0, 0], sizes = [8, 32], strides = [1, 1]} : vector<8x128xf32> to vector<8x32xf32>
    %35 = vector.extract_strided_slice %33 {offsets = [0, 32], sizes = [8, 32], strides = [1, 1]} : vector<8x128xf32> to vector<8x32xf32>
    %36 = vector.extract_strided_slice %33 {offsets = [0, 64], sizes = [8, 32], strides = [1, 1]} : vector<8x128xf32> to vector<8x32xf32>
    %cst_13 = arith.constant 2.000000e+00 : f32
    %37 = vector.broadcast %cst_13 : f32 to vector<8x32xf32>
    %38 = arith.mulf %37, %36 : vector<8x32xf32>
    %cst_14 = arith.constant 1.000000e+00 : f32
    %39 = vector.broadcast %cst_14 : f32 to vector<8x32xf32>
    %40 = arith.subf %38, %39 : vector<8x32xf32>
    %41 = vector.extract_strided_slice %33 {offsets = [0, 96], sizes = [8, 32], strides = [1, 1]} : vector<8x128xf32> to vector<8x32xf32>
    %42 = arith.mulf %35, %22 : vector<8x32xf32>
    %43 = arith.mulf %34, %40 : vector<8x32xf32>
    %44 = arith.addf %42, %43 : vector<8x32xf32>
    %45 = math.tanh %44 : vector<8x32xf32>
    %46 = arith.mulf %41, %45 : vector<8x32xf32>
    %c2 = arith.constant 2 : index
    %c0_15 = arith.constant 0 : index
    %c0_16 = arith.constant 0 : index
    %47 = vector.load %arg1[%c2, %c0_15, %c0_16] : memref<8x8x128xf32, #tpu.memory_space<vmem>>, vector<1x8x128xf32>
    %48 = vector.shape_cast %47 : vector<1x8x128xf32> to vector<8x128xf32>
    %cst_17 = arith.constant dense<0.000000e+00> : vector<8x128xf32>
    %49 = tpu.matmul %46, %0, %cst_17 {dimension_numbers = #tpu.dot_dimension_numbers<[1], [0], [0], [1], [0, 0, 1, 1], [], []>} : vector<8x32xf32>, vector<32x128xf32>, vector<8x128xf32> -> vector<8x128xf32>
    %50 = arith.addf %48, %49 : vector<8x128xf32>
    %51 = arith.negf %50 : vector<8x128xf32>
    %52 = math.exp %51 : vector<8x128xf32>
    %cst_18 = arith.constant 1.000000e+00 : f32
    %53 = vector.broadcast %cst_18 : f32 to vector<8x128xf32>
    %54 = arith.addf %53, %52 : vector<8x128xf32>
    %55 = arith.divf %53, %54 : vector<8x128xf32>
    %56 = vector.extract_strided_slice %55 {offsets = [0, 0], sizes = [8, 32], strides = [1, 1]} : vector<8x128xf32> to vector<8x32xf32>
    %57 = vector.extract_strided_slice %55 {offsets = [0, 32], sizes = [8, 32], strides = [1, 1]} : vector<8x128xf32> to vector<8x32xf32>
    %58 = vector.extract_strided_slice %55 {offsets = [0, 64], sizes = [8, 32], strides = [1, 1]} : vector<8x128xf32> to vector<8x32xf32>
    %cst_19 = arith.constant 2.000000e+00 : f32
    %59 = vector.broadcast %cst_19 : f32 to vector<8x32xf32>
    %60 = arith.mulf %59, %58 : vector<8x32xf32>
    %cst_20 = arith.constant 1.000000e+00 : f32
    %61 = vector.broadcast %cst_20 : f32 to vector<8x32xf32>
    %62 = arith.subf %60, %61 : vector<8x32xf32>
    %63 = vector.extract_strided_slice %55 {offsets = [0, 96], sizes = [8, 32], strides = [1, 1]} : vector<8x128xf32> to vector<8x32xf32>
    %64 = arith.mulf %57, %44 : vector<8x32xf32>
    %65 = arith.mulf %56, %62 : vector<8x32xf32>
    %66 = arith.addf %64, %65 : vector<8x32xf32>
    %67 = math.tanh %66 : vector<8x32xf32>
    %68 = arith.mulf %63, %67 : vector<8x32xf32>
    %c3 = arith.constant 3 : index
    %c0_21 = arith.constant 0 : index
    %c0_22 = arith.constant 0 : index
    %69 = vector.load %arg1[%c3, %c0_21, %c0_22] : memref<8x8x128xf32, #tpu.memory_space<vmem>>, vector<1x8x128xf32>
    %70 = vector.shape_cast %69 : vector<1x8x128xf32> to vector<8x128xf32>
    %cst_23 = arith.constant dense<0.000000e+00> : vector<8x128xf32>
    %71 = tpu.matmul %68, %0, %cst_23 {dimension_numbers = #tpu.dot_dimension_numbers<[1], [0], [0], [1], [0, 0, 1, 1], [], []>} : vector<8x32xf32>, vector<32x128xf32>, vector<8x128xf32> -> vector<8x128xf32>
    %72 = arith.addf %70, %71 : vector<8x128xf32>
    %73 = arith.negf %72 : vector<8x128xf32>
    %74 = math.exp %73 : vector<8x128xf32>
    %cst_24 = arith.constant 1.000000e+00 : f32
    %75 = vector.broadcast %cst_24 : f32 to vector<8x128xf32>
    %76 = arith.addf %75, %74 : vector<8x128xf32>
    %77 = arith.divf %75, %76 : vector<8x128xf32>
    %78 = vector.extract_strided_slice %77 {offsets = [0, 0], sizes = [8, 32], strides = [1, 1]} : vector<8x128xf32> to vector<8x32xf32>
    %79 = vector.extract_strided_slice %77 {offsets = [0, 32], sizes = [8, 32], strides = [1, 1]} : vector<8x128xf32> to vector<8x32xf32>
    %80 = vector.extract_strided_slice %77 {offsets = [0, 64], sizes = [8, 32], strides = [1, 1]} : vector<8x128xf32> to vector<8x32xf32>
    %cst_25 = arith.constant 2.000000e+00 : f32
    %81 = vector.broadcast %cst_25 : f32 to vector<8x32xf32>
    %82 = arith.mulf %81, %80 : vector<8x32xf32>
    %cst_26 = arith.constant 1.000000e+00 : f32
    %83 = vector.broadcast %cst_26 : f32 to vector<8x32xf32>
    %84 = arith.subf %82, %83 : vector<8x32xf32>
    %85 = vector.extract_strided_slice %77 {offsets = [0, 96], sizes = [8, 32], strides = [1, 1]} : vector<8x128xf32> to vector<8x32xf32>
    %86 = arith.mulf %79, %66 : vector<8x32xf32>
    %87 = arith.mulf %78, %84 : vector<8x32xf32>
    %88 = arith.addf %86, %87 : vector<8x32xf32>
    %89 = math.tanh %88 : vector<8x32xf32>
    %90 = arith.mulf %85, %89 : vector<8x32xf32>
    %c4 = arith.constant 4 : index
    %c0_27 = arith.constant 0 : index
    %c0_28 = arith.constant 0 : index
    %91 = vector.load %arg1[%c4, %c0_27, %c0_28] : memref<8x8x128xf32, #tpu.memory_space<vmem>>, vector<1x8x128xf32>
    %92 = vector.shape_cast %91 : vector<1x8x128xf32> to vector<8x128xf32>
    %cst_29 = arith.constant dense<0.000000e+00> : vector<8x128xf32>
    %93 = tpu.matmul %90, %0, %cst_29 {dimension_numbers = #tpu.dot_dimension_numbers<[1], [0], [0], [1], [0, 0, 1, 1], [], []>} : vector<8x32xf32>, vector<32x128xf32>, vector<8x128xf32> -> vector<8x128xf32>
    %94 = arith.addf %92, %93 : vector<8x128xf32>
    %95 = arith.negf %94 : vector<8x128xf32>
    %96 = math.exp %95 : vector<8x128xf32>
    %cst_30 = arith.constant 1.000000e+00 : f32
    %97 = vector.broadcast %cst_30 : f32 to vector<8x128xf32>
    %98 = arith.addf %97, %96 : vector<8x128xf32>
    %99 = arith.divf %97, %98 : vector<8x128xf32>
    %100 = vector.extract_strided_slice %99 {offsets = [0, 0], sizes = [8, 32], strides = [1, 1]} : vector<8x128xf32> to vector<8x32xf32>
    %101 = vector.extract_strided_slice %99 {offsets = [0, 32], sizes = [8, 32], strides = [1, 1]} : vector<8x128xf32> to vector<8x32xf32>
    %102 = vector.extract_strided_slice %99 {offsets = [0, 64], sizes = [8, 32], strides = [1, 1]} : vector<8x128xf32> to vector<8x32xf32>
    %cst_31 = arith.constant 2.000000e+00 : f32
    %103 = vector.broadcast %cst_31 : f32 to vector<8x32xf32>
    %104 = arith.mulf %103, %102 : vector<8x32xf32>
    %cst_32 = arith.constant 1.000000e+00 : f32
    %105 = vector.broadcast %cst_32 : f32 to vector<8x32xf32>
    %106 = arith.subf %104, %105 : vector<8x32xf32>
    %107 = vector.extract_strided_slice %99 {offsets = [0, 96], sizes = [8, 32], strides = [1, 1]} : vector<8x128xf32> to vector<8x32xf32>
    %108 = arith.mulf %101, %88 : vector<8x32xf32>
    %109 = arith.mulf %100, %106 : vector<8x32xf32>
    %110 = arith.addf %108, %109 : vector<8x32xf32>
    %111 = math.tanh %110 : vector<8x32xf32>
    %112 = arith.mulf %107, %111 : vector<8x32xf32>
    %c0_33 = arith.constant 0 : index
    %c0_34 = arith.constant 0 : index
    %113 = vector.load %arg3[%c0_33, %c0_34] : memref<8x128xf32, #tpu.memory_space<vmem>>, vector<8x32xf32>
    tpu.vector_store %arg3[%c0_33, %c0_34], %112 {strides = array<i32>} : memref<8x128xf32, #tpu.memory_space<vmem>>, vector<8x32xf32>,
    %c5 = arith.constant 5 : index
    %c0_35 = arith.constant 0 : index
    %c0_36 = arith.constant 0 : index
    %114 = vector.load %arg1[%c5, %c0_35, %c0_36] : memref<8x8x128xf32, #tpu.memory_space<vmem>>, vector<1x8x128xf32>
    %115 = vector.shape_cast %114 : vector<1x8x128xf32> to vector<8x128xf32>
    %cst_37 = arith.constant dense<0.000000e+00> : vector<8x128xf32>
    %116 = tpu.matmul %112, %0, %cst_37 {dimension_numbers = #tpu.dot_dimension_numbers<[1], [0], [0], [1], [0, 0, 1, 1], [], []>} : vector<8x32xf32>, vector<32x128xf32>, vector<8x128xf32> -> vector<8x128xf32>
    %117 = arith.addf %115, %116 : vector<8x128xf32>
    %118 = arith.negf %117 : vector<8x128xf32>
    %119 = math.exp %118 : vector<8x128xf32>
    %cst_38 = arith.constant 1.000000e+00 : f32
    %120 = vector.broadcast %cst_38 : f32 to vector<8x128xf32>
    %121 = arith.addf %120, %119 : vector<8x128xf32>
    %122 = arith.divf %120, %121 : vector<8x128xf32>
    %123 = vector.extract_strided_slice %122 {offsets = [0, 0], sizes = [8, 32], strides = [1, 1]} : vector<8x128xf32> to vector<8x32xf32>
    %124 = vector.extract_strided_slice %122 {offsets = [0, 32], sizes = [8, 32], strides = [1, 1]} : vector<8x128xf32> to vector<8x32xf32>
    %125 = vector.extract_strided_slice %122 {offsets = [0, 64], sizes = [8, 32], strides = [1, 1]} : vector<8x128xf32> to vector<8x32xf32>
    %cst_39 = arith.constant 2.000000e+00 : f32
    %126 = vector.broadcast %cst_39 : f32 to vector<8x32xf32>
    %127 = arith.mulf %126, %125 : vector<8x32xf32>
    %cst_40 = arith.constant 1.000000e+00 : f32
    %128 = vector.broadcast %cst_40 : f32 to vector<8x32xf32>
    %129 = arith.subf %127, %128 : vector<8x32xf32>
    %130 = vector.extract_strided_slice %122 {offsets = [0, 96], sizes = [8, 32], strides = [1, 1]} : vector<8x128xf32> to vector<8x32xf32>
    %131 = arith.mulf %124, %110 : vector<8x32xf32>
    %132 = arith.mulf %123, %129 : vector<8x32xf32>
    %133 = arith.addf %131, %132 : vector<8x32xf32>
    %134 = math.tanh %133 : vector<8x32xf32>
    %135 = arith.mulf %130, %134 : vector<8x32xf32>
    %c0_41 = arith.constant 0 : index
    %c32 = arith.constant 32 : index
    %136 = vector.load %arg3[%c0_41, %c32] : memref<8x128xf32, #tpu.memory_space<vmem>>, vector<8x32xf32>
    tpu.vector_store %arg3[%c0_41, %c32], %135 {strides = array<i32>} : memref<8x128xf32, #tpu.memory_space<vmem>>, vector<8x32xf32>,
    %c6 = arith.constant 6 : index
    %c0_42 = arith.constant 0 : index
    %c0_43 = arith.constant 0 : index
    %137 = vector.load %arg1[%c6, %c0_42, %c0_43] : memref<8x8x128xf32, #tpu.memory_space<vmem>>, vector<1x8x128xf32>
    %138 = vector.shape_cast %137 : vector<1x8x128xf32> to vector<8x128xf32>
    %cst_44 = arith.constant dense<0.000000e+00> : vector<8x128xf32>
    %139 = tpu.matmul %135, %0, %cst_44 {dimension_numbers = #tpu.dot_dimension_numbers<[1], [0], [0], [1], [0, 0, 1, 1], [], []>} : vector<8x32xf32>, vector<32x128xf32>, vector<8x128xf32> -> vector<8x128xf32>
    %140 = arith.addf %138, %139 : vector<8x128xf32>
    %141 = arith.negf %140 : vector<8x128xf32>
    %142 = math.exp %141 : vector<8x128xf32>
    %cst_45 = arith.constant 1.000000e+00 : f32
    %143 = vector.broadcast %cst_45 : f32 to vector<8x128xf32>
    %144 = arith.addf %143, %142 : vector<8x128xf32>
    %145 = arith.divf %143, %144 : vector<8x128xf32>
    %146 = vector.extract_strided_slice %145 {offsets = [0, 0], sizes = [8, 32], strides = [1, 1]} : vector<8x128xf32> to vector<8x32xf32>
    %147 = vector.extract_strided_slice %145 {offsets = [0, 32], sizes = [8, 32], strides = [1, 1]} : vector<8x128xf32> to vector<8x32xf32>
    %148 = vector.extract_strided_slice %145 {offsets = [0, 64], sizes = [8, 32], strides = [1, 1]} : vector<8x128xf32> to vector<8x32xf32>
    %cst_46 = arith.constant 2.000000e+00 : f32
    %149 = vector.broadcast %cst_46 : f32 to vector<8x32xf32>
    %150 = arith.mulf %149, %148 : vector<8x32xf32>
    %cst_47 = arith.constant 1.000000e+00 : f32
    %151 = vector.broadcast %cst_47 : f32 to vector<8x32xf32>
    %152 = arith.subf %150, %151 : vector<8x32xf32>
    %153 = vector.extract_strided_slice %145 {offsets = [0, 96], sizes = [8, 32], strides = [1, 1]} : vector<8x128xf32> to vector<8x32xf32>
    %154 = arith.mulf %147, %133 : vector<8x32xf32>
    %155 = arith.mulf %146, %152 : vector<8x32xf32>
    %156 = arith.addf %154, %155 : vector<8x32xf32>
    %157 = math.tanh %156 : vector<8x32xf32>
    %158 = arith.mulf %153, %157 : vector<8x32xf32>
    %c0_48 = arith.constant 0 : index
    %c64 = arith.constant 64 : index
    %159 = vector.load %arg3[%c0_48, %c64] : memref<8x128xf32, #tpu.memory_space<vmem>>, vector<8x32xf32>
    tpu.vector_store %arg3[%c0_48, %c64], %158 {strides = array<i32>} : memref<8x128xf32, #tpu.memory_space<vmem>>, vector<8x32xf32>,
    %c7 = arith.constant 7 : index
    %c0_49 = arith.constant 0 : index
    %c0_50 = arith.constant 0 : index
    %160 = vector.load %arg1[%c7, %c0_49, %c0_50] : memref<8x8x128xf32, #tpu.memory_space<vmem>>, vector<1x8x128xf32>
    %161 = vector.shape_cast %160 : vector<1x8x128xf32> to vector<8x128xf32>
    %cst_51 = arith.constant dense<0.000000e+00> : vector<8x128xf32>
    %162 = tpu.matmul %158, %0, %cst_51 {dimension_numbers = #tpu.dot_dimension_numbers<[1], [0], [0], [1], [0, 0, 1, 1], [], []>} : vector<8x32xf32>, vector<32x128xf32>, vector<8x128xf32> -> vector<8x128xf32>
    %163 = arith.addf %161, %162 : vector<8x128xf32>
    %164 = arith.negf %163 : vector<8x128xf32>
    %165 = math.exp %164 : vector<8x128xf32>
    %cst_52 = arith.constant 1.000000e+00 : f32
    %166 = vector.broadcast %cst_52 : f32 to vector<8x128xf32>
    %167 = arith.addf %166, %165 : vector<8x128xf32>
    %168 = arith.divf %166, %167 : vector<8x128xf32>
    %169 = vector.extract_strided_slice %168 {offsets = [0, 0], sizes = [8, 32], strides = [1, 1]} : vector<8x128xf32> to vector<8x32xf32>
    %170 = vector.extract_strided_slice %168 {offsets = [0, 32], sizes = [8, 32], strides = [1, 1]} : vector<8x128xf32> to vector<8x32xf32>
    %171 = vector.extract_strided_slice %168 {offsets = [0, 64], sizes = [8, 32], strides = [1, 1]} : vector<8x128xf32> to vector<8x32xf32>
    %cst_53 = arith.constant 2.000000e+00 : f32
    %172 = vector.broadcast %cst_53 : f32 to vector<8x32xf32>
    %173 = arith.mulf %172, %171 : vector<8x32xf32>
    %cst_54 = arith.constant 1.000000e+00 : f32
    %174 = vector.broadcast %cst_54 : f32 to vector<8x32xf32>
    %175 = arith.subf %173, %174 : vector<8x32xf32>
    %176 = vector.extract_strided_slice %168 {offsets = [0, 96], sizes = [8, 32], strides = [1, 1]} : vector<8x128xf32> to vector<8x32xf32>
    %177 = arith.mulf %170, %156 : vector<8x32xf32>
    %178 = arith.mulf %169, %175 : vector<8x32xf32>
    %179 = arith.addf %177, %178 : vector<8x32xf32>
    %180 = math.tanh %179 : vector<8x32xf32>
    %181 = arith.mulf %176, %180 : vector<8x32xf32>
    %c0_55 = arith.constant 0 : index
    %c96 = arith.constant 96 : index
    %182 = vector.load %arg3[%c0_55, %c96] : memref<8x128xf32, #tpu.memory_space<vmem>>, vector<8x32xf32>
    tpu.vector_store %arg3[%c0_55, %c96], %181 {strides = array<i32>} : memref<8x128xf32, #tpu.memory_space<vmem>>, vector<8x32xf32>,
    return
  }
  func.func @transform_0(%arg0: i32) -> (i32, i32, i32) {
    %c0_i32 = arith.constant 0 : i32
    %c0_i32_0 = arith.constant 0 : i32
    %c0_i32_1 = arith.constant 0 : i32
    return %c0_i32, %arg0, %c0_i32_0 : i32, i32, i32
  }
  func.func @transform_1(%arg0: i32) -> (i32, i32) {
    %c0_i32 = arith.constant 0 : i32
    %c0_i32_0 = arith.constant 0 : i32
    %c0_i32_1 = arith.constant 0 : i32
    return %c0_i32, %c0_i32_0 : i32, i32
  }
  func.func @transform_2(%arg0: i32) -> (i32, i32) {
    %c0_i32 = arith.constant 0 : i32
    %c0_i32_0 = arith.constant 0 : i32
    return %arg0, %c0_i32 : i32, i32
  }
}

</mosaic_0001>

<bundles_post_ra>
// kernel: mv_lstm_forward.1
= control target key start
LH: loop header
LB: loop body
LE: loop exit
PB: predicated region body
PF: predicated region fallthrough
CT: control target
= control target key end

     0   :  { %v1115_v0 = vmov 0.0|0.0   ;;  %vm1116_vm0 = vmmov 0   ;;  %v1117_v4 = vmov 0.0   ;;  %s1118_s18 = smov 64   ;;  %s1119_s19 = smov 32   ;;  %vm16_vm1 = vcmask 261120   ;;  %s1277_s1 = inlined_call_operand.vmem [shape: f32[32,128], index: 1, kind: input, shape index: {}]   ;;  %s1278_s0 = inlined_call_operand.vmem [shape: f32[8,8,128], index: 0, kind: input, shape index: {}]   ;;  %s1279_s2 = inlined_call_operand.vmem [shape: f32[8,128], index: 2, kind: output, shape index: {}]  }
   0x1   :  { %1013 = vmatprep.subr.bf16.mxu0 %v1115_v0  ;;  %v11_v1 = vld [vmem:[%s1277_s1] sm:$0xff]  ;;  %v12_v2 = vld [vmem:[%s1277_s1 + $0x8] sm:$0xff]  ;;  %v13_v3 = vld [vmem:[%s1277_s1 + $0x10] sm:$0xff]  ;;  %933 = vmatprep.mubr.msk.f32.mxu0 %vm1116_vm0, %v1117_v4  ;;  %s1120_s8 = smov 96   ;;  %vm637_vm2 = vcmask 523520   ;;  %vm745_vm3 = vcmask 785920  }
   0x2   :  { %v1148_v5 = vpack.c.bf16 %v12_v2, %v11_v1  ;;  %v14_v6 = vld [vmem:[%s1277_s1 + $0x18] sm:$0xff]  ;;  %1019 = vmatprep.subr.bf16.mxu1 %v1115_v0  ;;  %944 = vmatprep.mubr.msk.f32.mxu1 %vm1116_vm0, %v1117_v4  ;;  %v15_v8 = vld [vmem:[%s1278_s0] sm:$0xff]  ;;  %v857_v27 = vld [vmem:[%s1278_s0 + $0x8] sm:$0xff]  ;;  %vm849_vm4 = vcmask 1048320  }
   0x3   :  { %v1157_v7 = vpack.c.bf16 %v14_v6, %v13_v3  ;;  %v861_v46 = vld [vmem:[%s1278_s0 + $0x10] sm:$0xff]  ;;  %v865_v2 = vld [vmem:[%s1278_s0 + $0x18] sm:$0xff] }
   0x4   :  { %1015 = vmatpush3.bf16.msra.mxu0 %v1148_v5  ;;  %1021 = vmatpush3.bf16.msra.mxu1 %v1148_v5 }
   0x5   :  { %1016 = vmatprep.subr.bf16.mxu0 %v1115_v0  ;;  %1022 = vmatprep.subr.bf16.mxu1 %v1115_v0 }
   0x8   :  { %1018 = vmatpush3.bf16.msra.mxu0 %v1157_v7  ;;  %1024 = vmatpush3.bf16.msra.mxu1 %v1157_v7 }
   0x9   :  { %1025 = vmatprep.subr.bf16.mxu0 %v1115_v0  ;;  %1031 = vmatprep.subr.bf16.mxu1 %v1115_v0 }
   0xb   :  { %934 = vmatmul.mubr.f32.vlgmr.msra.gmra.mrb[0].mxu0 %v1117_v4 }
   0xc   :  { %1027 = vmatpush3.bf16.msra.mxu0 %v1148_v5  ;;  %955 = vmatprep.mubr.msk.f32.mxu0 %vm1116_vm0, %v1117_v4 }
   0xd   :  { %1028 = vmatprep.subr.bf16.mxu0 %v1115_v0 }
  0x10   :  { %1030 = vmatpush3.bf16.msra.mxu0 %v1157_v7 }
  0x11   :  { %1037 = vmatprep.subr.bf16.mxu0 %v1115_v0 }
  0xde   :  { %v86_v9 = vpop.f32.mrb[0].mxu0 }
  0xdf   :  { %v90_v10 = vadd.f32 %v86_v9, %v15_v8  ;;  %v935_v11 = vpop.f32.mrb[1].mxu0 }
  0xe1   :  { %v855_v12 = vmul.f32 -1.442695, %v90_v10 }
  0xe3   :  { %1067 = vpow2.f32 %v855_v12 }
  0xed   :  { %v1068_v13 = vpop.eup %1067 }
  0xee   :  { %v94_v14 = vadd.f32 1.0, %v1068_v13 }
  0xf0   :  { %1069 = vrcp.f32 %v94_v14 }
  0xfa   :  { %v1070_v15 = vpop.eup %1069 }
  0xfb   :  { %v97_v16 = vmul.f32 2.0, %v1070_v15  ;;  %v99_v20 = vmul.f32 0.0, %v1070_v15 }
  0xfd   :  { %v856_v17 = vadd.f32 -1.0, %v97_v16 }
  0xff   :  { %101 = vrot.lane.b32.xlu0 %v856_v17, %s1118_s18 }
 0x171   :  { %v102_v18 = vpop.permute.xlu0 %101 }
 0x172   :  { %v104_v19 = vmul.f32 %v1070_v15, %v102_v18 }
 0x174   :  { %106 = vrot.lane.b32.xlu0 %v104_v19, %s1119_s19 }
 0x1e6   :  { %v107_v21 = vpop.permute.xlu0 %106 }
 0x1e7   :  { %v109_v22 = vadd.f32 %v107_v21, %v99_v20 }
 0x1e9   :  { %1071 = vtanh.f32 %v109_v22 }
 0x1f3   :  { %v1072_v23 = vpop.eup %1071 }
 0x1f4   :  { %112 = vrot.lane.b32.xlu1 %v1072_v23, %s1118_s18 }
 0x266   :  { %v113_v24 = vpop.permute.xlu1 %112 }
 0x267   :  { %v115_v25 = vmul.f32 %v1070_v15, %v113_v24  ;;  %v869_v24 = vld [vmem:[%s1278_s0 + $0x20] sm:$0xff] }
 0x269   :  { %119 = vrot.lane.b32.xlu1 %v115_v25, %s1119_s19 }
 0x2db   :  { %v120_v26 = vpop.permute.xlu1 %119 }
 0x2dc   :  { %945 = vmatmul.mubr.msk.f32.vlgmr.msra.gmra.mrb[0].mxu1 %vm16_vm1, %v120_v26 }
 0x2dd   :  { %1033 = vmatpush3.bf16.msra.mxu1 %v1148_v5  ;;  %966 = vmatprep.mubr.msk.f32.mxu1 %vm1116_vm0, %v1117_v4 }
 0x2de   :  { %1034 = vmatprep.subr.bf16.mxu1 %v1115_v0 }
 0x2e1   :  { %1036 = vmatpush3.bf16.msra.mxu1 %v1157_v7 }
 0x2e2   :  { %1043 = vmatprep.subr.bf16.mxu1 %v1115_v0 }
 0x3af   :  { %v189_v28 = vpop.f32.mrb[0].mxu1 }
 0x3b0   :  { %v193_v29 = vadd.f32 %v857_v27, %v189_v28  ;;  %v946_v30 = vpop.f32.mrb[1].mxu1 }
 0x3b2   :  { %v859_v31 = vmul.f32 -1.442695, %v193_v29 }
 0x3b4   :  { %1073 = vpow2.f32 %v859_v31 }
 0x3be   :  { %v1074_v32 = vpop.eup %1073 }
 0x3bf   :  { %v197_v33 = vadd.f32 1.0, %v1074_v32 }
 0x3c1   :  { %1075 = vrcp.f32 %v197_v33 }
 0x3cb   :  { %v1076_v34 = vpop.eup %1075 }
 0x3cc   :  { %v200_v35 = vmul.f32 2.0, %v1076_v34  ;;  %v202_v39 = vmul.f32 %v1076_v34, %v109_v22 }
 0x3ce   :  { %v860_v36 = vadd.f32 -1.0, %v200_v35 }
 0x3d0   :  { %204 = vrot.lane.b32.xlu0 %v860_v36, %s1118_s18 }
 0x442   :  { %v205_v37 = vpop.permute.xlu0 %204 }
 0x443   :  { %v207_v38 = vmul.f32 %v1076_v34, %v205_v37 }
 0x445   :  { %209 = vrot.lane.b32.xlu1 %v207_v38, %s1119_s19 }
 0x4b7   :  { %v210_v40 = vpop.permute.xlu1 %209 }
 0x4b8   :  { %v212_v41 = vadd.f32 %v210_v40, %v202_v39 }
 0x4ba   :  { %1077 = vtanh.f32 %v212_v41 }
 0x4c4   :  { %v1078_v42 = vpop.eup %1077 }
 0x4c5   :  { %215 = vrot.lane.b32.xlu0 %v1078_v42, %s1118_s18 }
 0x537   :  { %v216_v43 = vpop.permute.xlu0 %215 }
 0x538   :  { %v218_v44 = vmul.f32 %v1076_v34, %v216_v43  ;;  %v873_v43 = vld [vmem:[%s1278_s0 + $0x28] sm:$0xff] }
 0x53a   :  { %222 = vrot.lane.b32.xlu1 %v218_v44, %s1119_s19 }
 0x5ac   :  { %v223_v45 = vpop.permute.xlu1 %222 }
 0x5ad   :  { %956 = vmatmul.mubr.msk.f32.vlgmr.msra.gmra.mrb[2].mxu0 %vm16_vm1, %v223_v45 }
 0x5ae   :  { %1039 = vmatpush3.bf16.msra.mxu0 %v1148_v5  ;;  %977 = vmatprep.mubr.msk.f32.mxu0 %vm1116_vm0, %v1117_v4 }
 0x5af   :  { %1040 = vmatprep.subr.bf16.mxu0 %v1115_v0 }
 0x5b2   :  { %1042 = vmatpush3.bf16.msra.mxu0 %v1157_v7 }
 0x5b3   :  { %1049 = vmatprep.subr.bf16.mxu0 %v1115_v0 }
 0x680   :  { %v292_v47 = vpop.f32.mrb[2].mxu0 }
 0x681   :  { %v296_v48 = vadd.f32 %v861_v46, %v292_v47  ;;  %v957_v49 = vpop.f32.mrb[3].mxu0 }
 0x683   :  { %v863_v50 = vmul.f32 -1.442695, %v296_v48 }
 0x685   :  { %1079 = vpow2.f32 %v863_v50 }
 0x68f   :  { %v1080_v51 = vpop.eup %1079 }
 0x690   :  { %v300_v52 = vadd.f32 1.0, %v1080_v51 }
 0x692   :  { %1081 = vrcp.f32 %v300_v52 }
 0x69c   :  { %v1082_v53 = vpop.eup %1081 }
 0x69d   :  { %v303_v54 = vmul.f32 2.0, %v1082_v53  ;;  %v305_v58 = vmul.f32 %v1082_v53, %v212_v41 }
 0x69f   :  { %v864_v55 = vadd.f32 -1.0, %v303_v54 }
 0x6a1   :  { %307 = vrot.lane.b32.xlu0 %v864_v55, %s1118_s18 }
 0x713   :  { %v308_v56 = vpop.permute.xlu0 %307 }
 0x714   :  { %v310_v57 = vmul.f32 %v1082_v53, %v308_v56 }
 0x716   :  { %312 = vrot.lane.b32.xlu1 %v310_v57, %s1119_s19 }
 0x788   :  { %v313_v59 = vpop.permute.xlu1 %312 }
 0x789   :  { %v315_v60 = vadd.f32 %v313_v59, %v305_v58  ;;  %v877_v58 = vld [vmem:[%s1278_s0 + $0x30] sm:$0xff] }
 0x78b   :  { %1083 = vtanh.f32 %v315_v60 }
 0x795   :  { %v1084_v61 = vpop.eup %1083 }
 0x796   :  { %318 = vrot.lane.b32.xlu0 %v1084_v61, %s1118_s18 }
 0x808   :  { %v319_v62 = vpop.permute.xlu0 %318 }
 0x809   :  { %v321_v63 = vmul.f32 %v1082_v53, %v319_v62 }
 0x80b   :  { %325 = vrot.lane.b32.xlu1 %v321_v63, %s1119_s19 }
 0x87d   :  { %v326_v1 = vpop.permute.xlu1 %325 }
 0x87e   :  { %967 = vmatmul.mubr.msk.f32.vlgmr.msra.gmra.mrb[2].mxu1 %vm16_vm1, %v326_v1 }
 0x87f   :  { %1045 = vmatpush3.bf16.msra.mxu1 %v1148_v5  ;;  %988 = vmatprep.mubr.msk.f32.mxu1 %vm1116_vm0, %v1117_v4 }
 0x880   :  { %1046 = vmatprep.subr.bf16.mxu1 %v1115_v0 }
 0x883   :  { %1048 = vmatpush3.bf16.msra.mxu1 %v1157_v7 }
 0x884   :  { %1055 = vmatprep.subr.bf16.mxu1 %v1115_v0 }
 0x951   :  { %v395_v3 = vpop.f32.mrb[2].mxu1 }
 0x952   :  { %v399_v6 = vadd.f32 %v865_v2, %v395_v3  ;;  %v968_v8 = vpop.f32.mrb[3].mxu1 }
 0x954   :  { %v867_v9 = vmul.f32 -1.442695, %v399_v6 }
 0x956   :  { %1085 = vpow2.f32 %v867_v9 }
 0x960   :  { %v1086_v10 = vpop.eup %1085 }
 0x961   :  { %v403_v11 = vadd.f32 1.0, %v1086_v10 }
 0x963   :  { %1087 = vrcp.f32 %v403_v11 }
 0x96d   :  { %v1088_v12 = vpop.eup %1087 }
 0x96e   :  { %v406_v13 = vmul.f32 2.0, %v1088_v12  ;;  %v408_v17 = vmul.f32 %v1088_v12, %v315_v60 }
 0x970   :  { %v868_v14 = vadd.f32 -1.0, %v406_v13 }
 0x972   :  { %410 = vrot.lane.b32.xlu0 %v868_v14, %s1118_s18 }
 0x9e4   :  { %v411_v15 = vpop.permute.xlu0 %410 }
 0x9e5   :  { %v413_v16 = vmul.f32 %v1088_v12, %v411_v15 }
 0x9e7   :  { %415 = vrot.lane.b32.xlu1 %v413_v16, %s1119_s19 }
 0xa59   :  { %v416_v18 = vpop.permute.xlu1 %415 }
 0xa5a   :  { %v418_v19 = vadd.f32 %v416_v18, %v408_v17  ;;  %v881_v17 = vld [vmem:[%s1278_s0 + $0x38] sm:$0xff] }
 0xa5c   :  { %1089 = vtanh.f32 %v418_v19 }
 0xa66   :  { %v1090_v20 = vpop.eup %1089 }
 0xa67   :  { %421 = vrot.lane.b32.xlu0 %v1090_v20, %s1118_s18 }
 0xad9   :  { %v422_v21 = vpop.permute.xlu0 %421 }
 0xada   :  { %v424_v22 = vmul.f32 %v1088_v12, %v422_v21 }
 0xadc   :  { %428 = vrot.lane.b32.xlu1 %v424_v22, %s1119_s19 }
 0xb4e   :  { %v429_v23 = vpop.permute.xlu1 %428 }
 0xb4f   :  { %978 = vmatmul.mubr.msk.f32.vlgmr.msra.gmra.mrb[4].mxu0 %vm16_vm1, %v429_v23 }
 0xb50   :  { %1051 = vmatpush3.bf16.msra.mxu0 %v1148_v5  ;;  %999 = vmatprep.mubr.msk.f32.mxu0 %vm1116_vm0, %v1117_v4 }
 0xb51   :  { %1052 = vmatprep.subr.bf16.mxu0 %v1115_v0 }
 0xb54   :  { %1054 = vmatpush3.bf16.msra.mxu0 %v1157_v7 }
 0xc22   :  { %v498_v25 = vpop.f32.mrb[4].mxu0 }
 0xc23   :  { %v502_v26 = vadd.f32 %v869_v24, %v498_v25  ;;  %v979_v27 = vpop.f32.mrb[5].mxu0 }
 0xc25   :  { %v871_v28 = vmul.f32 -1.442695, %v502_v26 }
 0xc27   :  { %1091 = vpow2.f32 %v871_v28 }
 0xc31   :  { %v1092_v29 = vpop.eup %1091 }
 0xc32   :  { %v506_v30 = vadd.f32 1.0, %v1092_v29 }
 0xc34   :  { %1093 = vrcp.f32 %v506_v30 }
 0xc3e   :  { %v1094_v31 = vpop.eup %1093 }
 0xc3f   :  { %v509_v32 = vmul.f32 2.0, %v1094_v31  ;;  %v511_v36 = vmul.f32 %v1094_v31, %v418_v19 }
 0xc41   :  { %v872_v33 = vadd.f32 -1.0, %v509_v32 }
 0xc43   :  { %513 = vrot.lane.b32.xlu0 %v872_v33, %s1118_s18 }
 0xcb5   :  { %v514_v34 = vpop.permute.xlu0 %513 }
 0xcb6   :  { %v516_v35 = vmul.f32 %v1094_v31, %v514_v34 }
 0xcb8   :  { %518 = vrot.lane.b32.xlu1 %v516_v35, %s1119_s19 }
 0xd2a   :  { %v519_v37 = vpop.permute.xlu1 %518 }
 0xd2b   :  { %v521_v38 = vadd.f32 %v519_v37, %v511_v36 }
 0xd2d   :  { %1095 = vtanh.f32 %v521_v38 }
 0xd37   :  { %v1096_v39 = vpop.eup %1095 }
 0xd38   :  { %524 = vrot.lane.b32.xlu0 %v1096_v39, %s1118_s18 }
 0xdaa   :  { %v525_v40 = vpop.permute.xlu0 %524 }
 0xdab   :  { %v527_v41 = vmul.f32 %v1094_v31, %v525_v40 }
 0xdad   :  { %529 = vrot.lane.b32.xlu1 %v527_v41, %s1119_s19 }
 0xe1f   :  { %v530_v42 = vpop.permute.xlu1 %529 }
 0xe20   :  { %532 = vst.msk [vmem:[%s1279_s2] sm:$0xff] %vm16_vm1, %v530_v42  ;;  %989 = vmatmul.mubr.msk.f32.vlgmr.msra.gmra.mrb[4].mxu1 %vm16_vm1, %v530_v42 }
 0xe21   :  { %1057 = vmatpush3.bf16.msra.mxu1 %v1148_v5  ;;  %1010 = vmatprep.mubr.msk.f32.mxu1 %vm1116_vm0, %v1117_v4 }
 0xe22   :  { %1058 = vmatprep.subr.bf16.mxu1 %v1115_v0 }
 0xe25   :  { %1060 = vmatpush3.bf16.msra.mxu1 %v1157_v7 }
 0xef3   :  { %v603_v44 = vpop.f32.mrb[4].mxu1 }
 0xef4   :  { %v607_v45 = vadd.f32 %v873_v43, %v603_v44  ;;  %v990_v46 = vpop.f32.mrb[5].mxu1 }
 0xef6   :  { %v875_v47 = vmul.f32 -1.442695, %v607_v45 }
 0xef8   :  { %1097 = vpow2.f32 %v875_v47 }
 0xf02   :  { %v1098_v48 = vpop.eup %1097 }
 0xf03   :  { %v611_v49 = vadd.f32 1.0, %v1098_v48 }
 0xf05   :  { %1099 = vrcp.f32 %v611_v49 }
 0xf0f   :  { %v1100_v5 = vpop.eup %1099 }
 0xf10   :  { %v614_v50 = vmul.f32 2.0, %v1100_v5  ;;  %v616_v7 = vmul.f32 %v1100_v5, %v521_v38 }
 0xf12   :  { %v876_v51 = vadd.f32 -1.0, %v614_v50 }
 0xf14   :  { %618 = vrot.lane.b32.xlu0 %v876_v51, %s1118_s18 }
 0xf86   :  { %v619_v0 = vpop.permute.xlu0 %618 }
 0xf87   :  { %v621_v4 = vmul.f32 %v1100_v5, %v619_v0 }
 0xf89   :  { %623 = vrot.lane.b32.xlu1 %v621_v4, %s1119_s19 }
 0xffb   :  { %v624_v52 = vpop.permute.xlu1 %623 }
 0xffc   :  { %v626_v53 = vadd.f32 %v624_v52, %v616_v7 }
 0xffe   :  { %1101 = vtanh.f32 %v626_v53 }
0x1008   :  { %v1102_v54 = vpop.eup %1101 }
0x1009   :  { %629 = vrot.lane.b32.xlu0 %v1102_v54, %s1118_s18 }
0x107b   :  { %v630_v55 = vpop.permute.xlu0 %629 }
0x107c   :  { %v632_v56 = vmul.f32 %v1100_v5, %v630_v55 }
0x107e   :  { %641 = vrot.lane.b32.xlu1 %v632_v56, %s1119_s19 }
0x10f0   :  { %v642_v57 = vpop.permute.xlu1 %641 }
0x10f1   :  { %1000 = vmatmul.mubr.msk.f32.vlgmr.msra.gmra.mrb[6].mxu0 %vm16_vm1, %v642_v57 }
0x11c4   :  { %v711_v59 = vpop.f32.mrb[6].mxu0 }
0x11c5   :  { %v715_v60 = vadd.f32 %v877_v58, %v711_v59  ;;  %v1001_v61 = vpop.f32.mrb[7].mxu0 }
0x11c7   :  { %v879_v62 = vmul.f32 -1.442695, %v715_v60 }
0x11c9   :  { %1103 = vpow2.f32 %v879_v62 }
0x11d3   :  { %v1104_v63 = vpop.eup %1103 }
0x11d4   :  { %v719_v1 = vadd.f32 1.0, %v1104_v63 }
0x11d6   :  { %1105 = vrcp.f32 %v719_v1 }
0x11e0   :  { %v1106_v2 = vpop.eup %1105 }
0x11e1   :  { %v722_v3 = vmul.f32 2.0, %v1106_v2  ;;  %v724_v10 = vmul.f32 %v1106_v2, %v626_v53 }
0x11e3   :  { %v880_v6 = vadd.f32 -1.0, %v722_v3 }
0x11e5   :  { %726 = vrot.lane.b32.xlu0 %v880_v6, %s1118_s18 }
0x1257   :  { %v727_v8 = vpop.permute.xlu0 %726 }
0x1258   :  { %v729_v9 = vmul.f32 %v1106_v2, %v727_v8 }
0x125a   :  { %731 = vrot.lane.b32.xlu1 %v729_v9, %s1119_s19 }
0x12cc   :  { %v732_v11 = vpop.permute.xlu1 %731 }
0x12cd   :  { %v734_v12 = vadd.f32 %v732_v11, %v724_v10 }
0x12cf   :  { %1107 = vtanh.f32 %v734_v12 }
0x12d9   :  { %v1108_v13 = vpop.eup %1107 }
0x12da   :  { %737 = vrot.lane.b32.xlu0 %v1108_v13, %s1118_s18 }
0x134c   :  { %v738_v14 = vpop.permute.xlu0 %737 }
0x134d   :  { %v740_v15 = vmul.f32 %v1106_v2, %v738_v14 }
0x134f   :  { %749 = vrot.lane.b32.xlu1 %v740_v15, %s1119_s19 }
0x13c1   :  { %v750_v16 = vpop.permute.xlu1 %749 }
0x13c2   :  { %1011 = vmatmul.mubr.msk.f32.vlgmr.msra.gmra.mrb[6].mxu1 %vm16_vm1, %v750_v16 }
0x1495   :  { %v819_v18 = vpop.f32.mrb[6].mxu1 }
0x1496   :  { %v823_v19 = vadd.f32 %v881_v17, %v819_v18  ;;  %v1012_v20 = vpop.f32.mrb[7].mxu1 }
0x1498   :  { %v883_v21 = vmul.f32 -1.442695, %v823_v19 }
0x149a   :  { %1109 = vpow2.f32 %v883_v21 }
0x14a4   :  { %v1110_v22 = vpop.eup %1109 }
0x14a5   :  { %v827_v23 = vadd.f32 1.0, %v1110_v22 }
0x14a7   :  { %1111 = vrcp.f32 %v827_v23 }
0x14b1   :  { %v1112_v24 = vpop.eup %1111 }
0x14b2   :  { %v830_v25 = vmul.f32 2.0, %v1112_v24  ;;  %v832_v31 = vmul.f32 %v1112_v24, %v734_v12 }
0x14b4   :  { %v884_v26 = vadd.f32 -1.0, %v830_v25 }
0x14b6   :  { %834 = vrot.lane.b32.xlu0 %v884_v26, %s1118_s18 }
0x14ba   :  { %634 = vrot.lane.b32.xlu0 %v632_v56, %s1118_s18 }
0x14be   :  { %742 = vrot.lane.b32.xlu0 %v740_v15, %s1120_s8 }
0x1528   :  { %v835_v27 = vpop.permute.xlu0 %834 }
0x1529   :  { %v837_v28 = vmul.f32 %v1112_v24, %v835_v27 }
0x152b   :  { %839 = vrot.lane.b32.xlu1 %v837_v28, %s1119_s19 }
0x152c   :  { %v635_v29 = vpop.permute.xlu0 %634 }
0x152d   :  { %638 = vst.msk [vmem:[%s1279_s2] sm:$0xff] %vm637_vm2, %v635_v29 }
0x1530   :  { %v743_v30 = vpop.permute.xlu0 %742 }
0x1531   :  { %746 = vst.msk [vmem:[%s1279_s2] sm:$0xff] %vm745_vm3, %v743_v30 }
0x159d   :  { %v840_v32 = vpop.permute.xlu1 %839 }
0x159e   :  { %v842_v33 = vadd.f32 %v840_v32, %v832_v31 }
0x15a0   :  { %1113 = vtanh.f32 %v842_v33 }
0x15aa   :  { %v1114_v34 = vpop.eup %1113 }
0x15ab   :  { %845 = vrot.lane.b32.xlu1 %v1114_v34, %s1118_s18 }
0x161d   :  { %v846_v35 = vpop.permute.xlu1 %845 }
0x161e   :  { %v848_v36 = vmul.f32 %v1112_v24, %v846_v35 }
0x1620   :  { %850 = vst.msk [vmem:[%s1279_s2] sm:$0xff] %vm849_vm4, %v848_v36 }

</bundles_post_ra>
